<compile_context>
chip_gen: v7x
topology: tpu7x:2x2x1
jax: 0.10.0
libtpu: 0.0.40
codegen_flags: <defaults>
</compile_context>

<pallas_src>
import functools

import numpy as np
import jax
import jax.numpy as jnp
from jax.experimental import pallas as pl
from jax.experimental.pallas import tpu as pltpu


def _vmem_budget_bytes():
    """Generation-aware VMEM budget: ~96 MiB on v5e/v6e (128 MiB physical),
    ~48 MiB on v7x (64 MiB physical).  Falls back to a v7x-safe budget."""
    try:
        cap = int(pltpu.get_tpu_info().vmem_capacity_bytes)
    except Exception:
        cap = 64 * 1024 * 1024
    return int(cap) * 3 // 4


def _pick_block_batch(B, ncrops, D, itemsize, vmem_budget):
    """Largest batch block TB (multiple of the dtype sublane tile, dividing B)
    whose working set fits the VMEM budget.

    Per batch row of one block:
      * double-buffered inputs for all crops (student + 2 teacher crops):
            2 * (ncrops + 2) * D * itemsize
      * ~4 live f32 (row, D) temporaries after the logZ factorization
        (q0, q1, q0+q1, current student z / exp):  4 * D * 4
    """
    sub = max(8, 32 // max(1, itemsize))          # 8 f32 / 16 bf16 / 32 int8
    per_row = 2 * (ncrops + 2) * D * itemsize + 4 * D * 4
    fit = max(sub, (int(vmem_budget // per_row) // sub) * sub)
    if B <= sub or B % sub != 0:
        return B                                  # tiny/odd batch: one full block
    best = sub
    for cand in range(sub, B + 1, sub):
        if B % cand == 0 and cand <= fit:
            best = cand
    return best


def _dino_loss_kernel(ncrops,
                      scalars_ref, student_ref, teacher_ref, center_ref,
                      loss_ref, csum_ref,
                      row_acc, csum_acc):
    # scalars (SMEM f32[2]): [1/student_temp, 1/teacher_temp(epoch)]
    inv_student_temp = scalars_ref[0]
    inv_teacher_temp = scalars_ref[1]

    i = pl.program_id(1)                          # inner (reduction) axis

    @pl.when(i == 0)
    def _init():
        row_acc[...] = jnp.zeros_like(row_acc)
        csum_acc[...] = jnp.zeros_like(csum_acc)

    center = center_ref[...].astype(jnp.float32)                  # (1, D)

    # ---- teacher: softmax((teacher - center) / temp) per global crop ----
    t0 = teacher_ref[0].astype(jnp.float32)                       # (TB, D)
    t1 = teacher_ref[1].astype(jnp.float32)

    def _softmax_centered(x):
        z = (x - center) * inv_teacher_temp
        z = z - jnp.max(z, axis=-1, keepdims=True)
        e = jnp.exp(z)
        return e * pl.reciprocal(jnp.sum(e, axis=-1, keepdims=True),
                                 approx=False)

    q0 = _softmax_centered(t0)
    q1 = _softmax_centered(t1)
    qsum = q0 + q1

    # ---- student crops: factored cross-entropy --------------------------
    # sum_d q_d * (z_d - logZ) = dot(q, z) - logZ  since sum_d q_d == 1,
    # so the logZ subtraction is per-row and no log-prob array is built.
    tb = student_ref.shape[1]
    ce_rows = jnp.zeros((tb, 1), jnp.float32)
    for v in range(ncrops):
        z = student_ref[v].astype(jnp.float32) * inv_student_temp  # (TB, D)
        m = jnp.max(z, axis=-1, keepdims=True)
        logz = m + jnp.log(jnp.sum(jnp.exp(z - m), axis=-1, keepdims=True))
        if v == 0:
            q, nq = q1, 1.0      # student crop 0 pairs only with teacher crop 1
        elif v == 1:
            q, nq = q0, 1.0      # student crop 1 pairs only with teacher crop 0
        else:
            q, nq = qsum, 2.0    # every other crop pairs with both teachers
        dot_qz = jnp.sum(q * z, axis=-1, keepdims=True)            # (TB, 1)
        ce_rows = ce_rows + ((logz if nq == 1.0 else logz * nq) - dot_qz)

    # vector partial accumulation; the single scalar reduce happens at finalize
    row_acc[...] = row_acc[...] + ce_rows

    # ---- teacher sum for the center EMA (reuses the raw teacher loads) ---
    csum_acc[...] = csum_acc[...] + jnp.sum(t0 + t1, axis=0, keepdims=True)

    @pl.when(i == pl.num_programs(1) - 1)
    def _finalize():
        total = jnp.sum(row_acc[...])             # one cross-lane/sublane reduce
        loss_ref[...] = jnp.full(loss_ref.shape, total, jnp.float32)
        csum_ref[...] = csum_acc[...].reshape(csum_ref.shape)


class DINOLossPallas:
    """JAX/Pallas port of the PyTorch DINOLoss module (forward pass)."""

    def __init__(self, out_dim, ncrops, warmup_teacher_temp, teacher_temp,
                 warmup_teacher_temp_epochs, nepochs, student_temp=0.1,
                 center_momentum=0.9, block_batch=None, core_splits=2):
        self.student_temp = float(student_temp)
        self.center_momentum = float(center_momentum)
        self.ncrops = int(ncrops)
        self.out_dim = int(out_dim)
        self.block_batch = block_batch
        self.core_splits = int(core_splits)
        # register_buffer('center', zeros(1, out_dim)) — deterministic init.
        self.center = jnp.zeros((1, out_dim), jnp.float32)
        self.teacher_temp_schedule = np.concatenate((
            np.linspace(warmup_teacher_temp, teacher_temp,
                        warmup_teacher_temp_epochs),
            np.ones(nepochs - warmup_teacher_temp_epochs) * teacher_temp))

    def __call__(self, student_output, teacher_output, epoch):
        temp = float(self.teacher_temp_schedule[epoch])
        ncrops, D = self.ncrops, self.out_dim
        B = teacher_output.shape[0] // 2
        assert ncrops >= 2
        assert teacher_output.shape == (2 * B, D)
        assert student_output.shape == (ncrops * B, D)

        # crop-major 3-D views: free (row-major contiguous) reshapes
        student3 = student_output.reshape(ncrops, B, D)
        teacher3 = teacher_output.reshape(2, B, D)

        itemsize = jnp.dtype(student_output.dtype).itemsize
        vmem_budget = _vmem_budget_bytes()
        if self.block_batch is not None:
            tb = int(self.block_batch)
        else:
            tb = _pick_block_batch(B, ncrops, D, itemsize, vmem_budget)
        tb = min(tb, B)
        if not (B % tb == 0 and (tb % 8 == 0 or tb == B)):
            tb = B                                  # fall back to one full block

        steps_total = B // tb
        p = self.core_splits if (self.core_splits > 1
                                 and steps_total >= self.core_splits
                                 and steps_total % self.core_splits == 0) else 1
        spc = steps_total // p                      # reduction steps per core
        grid = (p, spc)

        n_terms = 2 * (ncrops - 1)
        # reciprocal temperatures -> scalar-broadcast multiplies in the kernel
        scalars = jnp.array([1.0 / self.student_temp, 1.0 / temp], jnp.float32)

        n_elems = (ncrops + 2) * B * D
        cost = pl.CostEstimate(
            flops=8 * n_elems,
            transcendentals=n_elems,
            bytes_accessed=int(n_elems * itemsize + D * 4
                               + p * (D + 128) * 4))

        kernel = functools.partial(_dino_loss_kernel, ncrops)
        loss_part, csum_part = pl.pallas_call(
            kernel,
            grid=grid,
            out_shape=(jax.ShapeDtypeStruct((p, 1, 128), jnp.float32),
                       jax.ShapeDtypeStruct((p, 1, D), jnp.float32)),
            in_specs=[
                pl.BlockSpec(memory_space=pltpu.MemorySpace.SMEM),       # scalars
                pl.BlockSpec((ncrops, tb, D), lambda c, i: (0, c * spc + i, 0)),
                pl.BlockSpec((2, tb, D), lambda c, i: (0, c * spc + i, 0)),
                pl.BlockSpec((1, D), lambda c, i: (0, 0)),               # center
            ],
            out_specs=(
                pl.BlockSpec((1, 1, 128), lambda c, i: (c, 0, 0)),  # per-core loss
                pl.BlockSpec((1, 1, D), lambda c, i: (c, 0, 0)),    # per-core t-sum
            ),
            scratch_shapes=[
                pltpu.VMEM((tb, 1), jnp.float32),    # per-row CE accumulator
                pltpu.VMEM((1, D), jnp.float32),     # teacher-sum accumulator
            ],
            compiler_params=pltpu.CompilerParams(
                dimension_semantics=("parallel", "arbitrary"),
                vmem_limit_bytes=vmem_budget),
            cost_estimate=cost,
        )(scalars, student3, teacher3, self.center)

        # tiny XLA epilogue: combine per-core partials, normalize, center EMA
        loss = jnp.sum(loss_part[:, 0, 0]) / jnp.float32(B * n_terms)
        # TODO(synk): world_size assumed 1 (no dist.all_reduce equivalent here)
        batch_center = jnp.sum(csum_part, axis=(0, 1)) / jnp.float32(2 * B)
        self.center = (self.center * self.center_momentum
                       + batch_center[None, :] * (1.0 - self.center_momentum))
        return loss


def _reference(student, teacher, center, ncrops, batch, student_temp,
               teacher_temp, momentum):
    """Pure-JAX reference matching the PyTorch forward (f32 compute)."""
    student = student.astype(jnp.float32)
    teacher = teacher.astype(jnp.float32)
    s = student / student_temp
    q = jax.nn.softmax((teacher - center) / teacher_temp, axis=-1)
    logp = jax.nn.log_softmax(s, axis=-1)
    total, n = 0.0, 0
    for iq in range(2):
        qq = q[iq * batch:(iq + 1) * batch]
        for v in range(ncrops):
            if v == iq:
                continue
            lp = logp[v * batch:(v + 1) * batch]
            total = total + jnp.mean(jnp.sum(-qq * lp, axis=-1))
            n += 1
    loss = total / n
    bc = jnp.sum(teacher, axis=0, keepdims=True) / teacher.shape[0]
    new_center = center * momentum + bc * (1.0 - momentum)
    return loss, new_center


if __name__ == "__main__":
    B = 64          # per-crop batch
    D = 256         # out_dim (lane-dense)
    NCROPS = 4
    EPOCH = 2
    TB = 16         # bf16-friendly 16-row tile -> grid (2 core-splits, 2 steps)

    key = jax.random.PRNGKey(0)
    k1, k2 = jax.random.split(key)
    # keep inputs bf16 at the pallas_call boundary (kernel upcasts to f32)
    student_output = jax.random.normal(
        k1, (NCROPS * B, D), jnp.float32).astype(jnp.bfloat16)
    teacher_output = jax.random.normal(
        k2, (2 * B, D), jnp.float32).astype(jnp.bfloat16)

    loss_mod = DINOLossPallas(out_dim=D, ncrops=NCROPS,
                              warmup_teacher_temp=0.04, teacher_temp=0.07,
                              warmup_teacher_temp_epochs=5, nepochs=20,
                              block_batch=TB)

    center_before = loss_mod.center
    loss = loss_mod(student_output, teacher_output, EPOCH)
    jax.block_until_ready(loss)
    jax.block_until_ready(loss_mod.center)

    # correctness check against pure-JAX reference
    ref_loss, ref_center = _reference(
        student_output, teacher_output, center_before, NCROPS, B,
        loss_mod.student_temp,
        float(loss_mod.teacher_temp_schedule[EPOCH]),
        loss_mod.center_momentum)
    assert np.allclose(np.asarray(loss), np.asarray(ref_loss),
                       rtol=5e-4, atol=1e-4), (loss, ref_loss)
    assert np.allclose(np.asarray(loss_mod.center), np.asarray(ref_center),
                       rtol=1e-4, atol=1e-5)

    print("KERNEL_OK")
</pallas_src>

<mosaic_0001>
module attributes {stable_mosaic.version = 11 : i64} {
  func.func @_dino_loss_kernel(%arg0: i32, %arg1: i32, %arg2: memref<2xf32, #tpu.memory_space<smem>>, %arg3: memref<4x16x256xbf16, #tpu.memory_space<vmem>>, %arg4: memref<2x16x256xbf16, #tpu.memory_space<vmem>>, %arg5: memref<1x256xf32, #tpu.memory_space<vmem>>, %arg6: memref<1x1x128xf32, #tpu.memory_space<vmem>>, %arg7: memref<1x1x256xf32, #tpu.memory_space<vmem>>, %arg8: memref<16x1xf32, #tpu.memory_space<vmem>>, %arg9: memref<1x256xf32, #tpu.memory_space<vmem>>) attributes {dimension_semantics = [#tpu.dimension_semantics<parallel>, #tpu.dimension_semantics<arbitrary>], iteration_bounds = array<i64: 2, 2>, scalar_prefetch = 0 : i64, scratch_operands = 2 : i64, tpu.core_type = #tpu.core_type<tc>, window_params = [{transform_indices = @transform_0, window_bounds = array<i64: 2>}, {transform_indices = @transform_1, window_bounds = array<i64: 4, 16, 256>}, {transform_indices = @transform_2, window_bounds = array<i64: 2, 16, 256>}, {pipeline_mode = #tpu.pipeline_mode<synchronous>, transform_indices = @transform_3, window_bounds = array<i64: 1, 256>}, {transform_indices = @transform_4, window_bounds = array<i64: 1, 1, 128>}, {transform_indices = @transform_5, window_bounds = array<i64: 1, 1, 256>}]} {
    %c0 = arith.constant 0 : index
    %0 = memref.load %arg2[%c0] : memref<2xf32, #tpu.memory_space<smem>>
    %c1 = arith.constant 1 : index
    %1 = memref.load %arg2[%c1] : memref<2xf32, #tpu.memory_space<smem>>
    %c0_i32 = arith.constant 0 : i32
    %2 = arith.cmpi eq, %arg1, %c0_i32 : i32
    %3 = arith.extui %2 : i1 to i32
    %c0_i32_0 = arith.constant 0 : i32
    %4 = arith.cmpi ne, %3, %c0_i32_0 : i32
    scf.if %4 {
      %cst_47 = arith.constant 0.000000e+00 : f32
      %134 = vector.broadcast %cst_47 : f32 to vector<16x1xf32>
      %c0_48 = arith.constant 0 : index
      %c0_49 = arith.constant 0 : index
      %135 = vector.load %arg8[%c0_48, %c0_49] : memref<16x1xf32, #tpu.memory_space<vmem>>, vector<16x1xf32>
      tpu.vector_store %arg8[%c0_48, %c0_49], %134 {strides = array<i32>} : memref<16x1xf32, #tpu.memory_space<vmem>>, vector<16x1xf32>,
      %cst_50 = arith.constant 0.000000e+00 : f32
      %136 = vector.broadcast %cst_50 : f32 to vector<1x256xf32>
      %c0_51 = arith.constant 0 : index
      %c0_52 = arith.constant 0 : index
      %137 = vector.load %arg9[%c0_51, %c0_52] : memref<1x256xf32, #tpu.memory_space<vmem>>, vector<1x256xf32>
      tpu.vector_store %arg9[%c0_51, %c0_52], %136 {strides = array<i32>} : memref<1x256xf32, #tpu.memory_space<vmem>>, vector<1x256xf32>,
    } else {
    }
    %c0_1 = arith.constant 0 : index
    %c0_2 = arith.constant 0 : index
    %5 = vector.load %arg5[%c0_1, %c0_2] : memref<1x256xf32, #tpu.memory_space<vmem>>, vector<1x256xf32>
    %c0_3 = arith.constant 0 : index
    %c0_4 = arith.constant 0 : index
    %c0_5 = arith.constant 0 : index
    %6 = vector.load %arg4[%c0_3, %c0_4, %c0_5] : memref<2x16x256xbf16, #tpu.memory_space<vmem>>, vector<1x16x256xbf16>
    %7 = vector.shape_cast %6 : vector<1x16x256xbf16> to vector<16x256xbf16>
    %8 = arith.extf %7 : vector<16x256xbf16> to vector<16x256xf32>
    %c1_6 = arith.constant 1 : index
    %c0_7 = arith.constant 0 : index
    %c0_8 = arith.constant 0 : index
    %9 = vector.load %arg4[%c1_6, %c0_7, %c0_8] : memref<2x16x256xbf16, #tpu.memory_space<vmem>>, vector<1x16x256xbf16>
    %10 = vector.shape_cast %9 : vector<1x16x256xbf16> to vector<16x256xbf16>
    %11 = arith.extf %10 : vector<16x256xbf16> to vector<16x256xf32>
    %12 = vector.broadcast %5 : vector<1x256xf32> to vector<16x256xf32>
    %13 = arith.subf %8, %12 : vector<16x256xf32>
    %14 = vector.broadcast %1 : f32 to vector<16x256xf32>
    %15 = arith.mulf %13, %14 : vector<16x256xf32>
    %cst = arith.constant dense<0xFF800000> : vector<16xf32>
    %16 = vector.multi_reduction <maximumf>, %15, %cst [1] : vector<16x256xf32> to vector<16xf32>
    %17 = vector.shape_cast %16 : vector<16xf32> to vector<16x1xf32>
    %18 = vector.broadcast %17 : vector<16x1xf32> to vector<16x256xf32>
    %19 = arith.subf %15, %18 : vector<16x256xf32>
    %20 = math.exp %19 : vector<16x256xf32>
    %cst_9 = arith.constant dense<0.000000e+00> : vector<16xf32>
    %21 = vector.multi_reduction <add>, %20, %cst_9 [1] : vector<16x256xf32> to vector<16xf32>
    %22 = vector.shape_cast %21 : vector<16xf32> to vector<16x1xf32>
    %23 = tpu.reciprocal %22 : vector<16x1xf32> -> vector<16x1xf32>
    %24 = vector.broadcast %23 : vector<16x1xf32> to vector<16x256xf32>
    %25 = arith.mulf %20, %24 : vector<16x256xf32>
    %26 = vector.broadcast %5 : vector<1x256xf32> to vector<16x256xf32>
    %27 = arith.subf %11, %26 : vector<16x256xf32>
    %28 = vector.broadcast %1 : f32 to vector<16x256xf32>
    %29 = arith.mulf %27, %28 : vector<16x256xf32>
    %cst_10 = arith.constant dense<0xFF800000> : vector<16xf32>
    %30 = vector.multi_reduction <maximumf>, %29, %cst_10 [1] : vector<16x256xf32> to vector<16xf32>
    %31 = vector.shape_cast %30 : vector<16xf32> to vector<16x1xf32>
    %32 = vector.broadcast %31 : vector<16x1xf32> to vector<16x256xf32>
    %33 = arith.subf %29, %32 : vector<16x256xf32>
    %34 = math.exp %33 : vector<16x256xf32>
    %cst_11 = arith.constant dense<0.000000e+00> : vector<16xf32>
    %35 = vector.multi_reduction <add>, %34, %cst_11 [1] : vector<16x256xf32> to vector<16xf32>
    %36 = vector.shape_cast %35 : vector<16xf32> to vector<16x1xf32>
    %37 = tpu.reciprocal %36 : vector<16x1xf32> -> vector<16x1xf32>
    %38 = vector.broadcast %37 : vector<16x1xf32> to vector<16x256xf32>
    %39 = arith.mulf %34, %38 : vector<16x256xf32>
    %40 = arith.addf %25, %39 : vector<16x256xf32>
    %cst_12 = arith.constant 0.000000e+00 : f32
    %41 = vector.broadcast %cst_12 : f32 to vector<16x1xf32>
    %c0_13 = arith.constant 0 : index
    %c0_14 = arith.constant 0 : index
    %c0_15 = arith.constant 0 : index
    %42 = vector.load %arg3[%c0_13, %c0_14, %c0_15] : memref<4x16x256xbf16, #tpu.memory_space<vmem>>, vector<1x16x256xbf16>
    %43 = vector.shape_cast %42 : vector<1x16x256xbf16> to vector<16x256xbf16>
    %44 = arith.extf %43 : vector<16x256xbf16> to vector<16x256xf32>
    %45 = vector.broadcast %0 : f32 to vector<16x256xf32>
    %46 = arith.mulf %44, %45 : vector<16x256xf32>
    %cst_16 = arith.constant dense<0xFF800000> : vector<16xf32>
    %47 = vector.multi_reduction <maximumf>, %46, %cst_16 [1] : vector<16x256xf32> to vector<16xf32>
    %48 = vector.shape_cast %47 : vector<16xf32> to vector<16x1xf32>
    %49 = vector.broadcast %48 : vector<16x1xf32> to vector<16x256xf32>
    %50 = arith.subf %46, %49 : vector<16x256xf32>
    %51 = math.exp %50 : vector<16x256xf32>
    %cst_17 = arith.constant dense<0.000000e+00> : vector<16xf32>
    %52 = vector.multi_reduction <add>, %51, %cst_17 [1] : vector<16x256xf32> to vector<16xf32>
    %53 = vector.shape_cast %52 : vector<16xf32> to vector<16x1xf32>
    %54 = math.log %53 : vector<16x1xf32>
    %55 = arith.addf %48, %54 : vector<16x1xf32>
    %56 = arith.mulf %39, %46 : vector<16x256xf32>
    %cst_18 = arith.constant dense<0.000000e+00> : vector<16xf32>
    %57 = vector.multi_reduction <add>, %56, %cst_18 [1] : vector<16x256xf32> to vector<16xf32>
    %58 = vector.shape_cast %57 : vector<16xf32> to vector<16x1xf32>
    %59 = arith.subf %55, %58 : vector<16x1xf32>
    %60 = arith.addf %41, %59 : vector<16x1xf32>
    %c1_19 = arith.constant 1 : index
    %c0_20 = arith.constant 0 : index
    %c0_21 = arith.constant 0 : index
    %61 = vector.load %arg3[%c1_19, %c0_20, %c0_21] : memref<4x16x256xbf16, #tpu.memory_space<vmem>>, vector<1x16x256xbf16>
    %62 = vector.shape_cast %61 : vector<1x16x256xbf16> to vector<16x256xbf16>
    %63 = arith.extf %62 : vector<16x256xbf16> to vector<16x256xf32>
    %64 = vector.broadcast %0 : f32 to vector<16x256xf32>
    %65 = arith.mulf %63, %64 : vector<16x256xf32>
    %cst_22 = arith.constant dense<0xFF800000> : vector<16xf32>
    %66 = vector.multi_reduction <maximumf>, %65, %cst_22 [1] : vector<16x256xf32> to vector<16xf32>
    %67 = vector.shape_cast %66 : vector<16xf32> to vector<16x1xf32>
    %68 = vector.broadcast %67 : vector<16x1xf32> to vector<16x256xf32>
    %69 = arith.subf %65, %68 : vector<16x256xf32>
    %70 = math.exp %69 : vector<16x256xf32>
    %cst_23 = arith.constant dense<0.000000e+00> : vector<16xf32>
    %71 = vector.multi_reduction <add>, %70, %cst_23 [1] : vector<16x256xf32> to vector<16xf32>
    %72 = vector.shape_cast %71 : vector<16xf32> to vector<16x1xf32>
    %73 = math.log %72 : vector<16x1xf32>
    %74 = arith.addf %67, %73 : vector<16x1xf32>
    %75 = arith.mulf %25, %65 : vector<16x256xf32>
    %cst_24 = arith.constant dense<0.000000e+00> : vector<16xf32>
    %76 = vector.multi_reduction <add>, %75, %cst_24 [1] : vector<16x256xf32> to vector<16xf32>
    %77 = vector.shape_cast %76 : vector<16xf32> to vector<16x1xf32>
    %78 = arith.subf %74, %77 : vector<16x1xf32>
    %79 = arith.addf %60, %78 : vector<16x1xf32>
    %c2 = arith.constant 2 : index
    %c0_25 = arith.constant 0 : index
    %c0_26 = arith.constant 0 : index
    %80 = vector.load %arg3[%c2, %c0_25, %c0_26] : memref<4x16x256xbf16, #tpu.memory_space<vmem>>, vector<1x16x256xbf16>
    %81 = vector.shape_cast %80 : vector<1x16x256xbf16> to vector<16x256xbf16>
    %82 = arith.extf %81 : vector<16x256xbf16> to vector<16x256xf32>
    %83 = vector.broadcast %0 : f32 to vector<16x256xf32>
    %84 = arith.mulf %82, %83 : vector<16x256xf32>
    %cst_27 = arith.constant dense<0xFF800000> : vector<16xf32>
    %85 = vector.multi_reduction <maximumf>, %84, %cst_27 [1] : vector<16x256xf32> to vector<16xf32>
    %86 = vector.shape_cast %85 : vector<16xf32> to vector<16x1xf32>
    %87 = vector.broadcast %86 : vector<16x1xf32> to vector<16x256xf32>
    %88 = arith.subf %84, %87 : vector<16x256xf32>
    %89 = math.exp %88 : vector<16x256xf32>
    %cst_28 = arith.constant dense<0.000000e+00> : vector<16xf32>
    %90 = vector.multi_reduction <add>, %89, %cst_28 [1] : vector<16x256xf32> to vector<16xf32>
    %91 = vector.shape_cast %90 : vector<16xf32> to vector<16x1xf32>
    %92 = math.log %91 : vector<16x1xf32>
    %93 = arith.addf %86, %92 : vector<16x1xf32>
    %94 = arith.mulf %40, %84 : vector<16x256xf32>
    %cst_29 = arith.constant dense<0.000000e+00> : vector<16xf32>
    %95 = vector.multi_reduction <add>, %94, %cst_29 [1] : vector<16x256xf32> to vector<16xf32>
    %96 = vector.shape_cast %95 : vector<16xf32> to vector<16x1xf32>
    %cst_30 = arith.constant 2.000000e+00 : f32
    %97 = vector.broadcast %cst_30 : f32 to vector<16x1xf32>
    %98 = arith.mulf %93, %97 : vector<16x1xf32>
    %99 = arith.subf %98, %96 : vector<16x1xf32>
    %100 = arith.addf %79, %99 : vector<16x1xf32>
    %c3 = arith.constant 3 : index
    %c0_31 = arith.constant 0 : index
    %c0_32 = arith.constant 0 : index
    %101 = vector.load %arg3[%c3, %c0_31, %c0_32] : memref<4x16x256xbf16, #tpu.memory_space<vmem>>, vector<1x16x256xbf16>
    %102 = vector.shape_cast %101 : vector<1x16x256xbf16> to vector<16x256xbf16>
    %103 = arith.extf %102 : vector<16x256xbf16> to vector<16x256xf32>
    %104 = vector.broadcast %0 : f32 to vector<16x256xf32>
    %105 = arith.mulf %103, %104 : vector<16x256xf32>
    %cst_33 = arith.constant dense<0xFF800000> : vector<16xf32>
    %106 = vector.multi_reduction <maximumf>, %105, %cst_33 [1] : vector<16x256xf32> to vector<16xf32>
    %107 = vector.shape_cast %106 : vector<16xf32> to vector<16x1xf32>
    %108 = vector.broadcast %107 : vector<16x1xf32> to vector<16x256xf32>
    %109 = arith.subf %105, %108 : vector<16x256xf32>
    %110 = math.exp %109 : vector<16x256xf32>
    %cst_34 = arith.constant dense<0.000000e+00> : vector<16xf32>
    %111 = vector.multi_reduction <add>, %110, %cst_34 [1] : vector<16x256xf32> to vector<16xf32>
    %112 = vector.shape_cast %111 : vector<16xf32> to vector<16x1xf32>
    %113 = math.log %112 : vector<16x1xf32>
    %114 = arith.addf %107, %113 : vector<16x1xf32>
    %115 = arith.mulf %40, %105 : vector<16x256xf32>
    %cst_35 = arith.constant dense<0.000000e+00> : vector<16xf32>
    %116 = vector.multi_reduction <add>, %115, %cst_35 [1] : vector<16x256xf32> to vector<16xf32>
    %117 = vector.shape_cast %116 : vector<16xf32> to vector<16x1xf32>
    %cst_36 = arith.constant 2.000000e+00 : f32
    %118 = vector.broadcast %cst_36 : f32 to vector<16x1xf32>
    %119 = arith.mulf %114, %118 : vector<16x1xf32>
    %120 = arith.subf %119, %117 : vector<16x1xf32>
    %121 = arith.addf %100, %120 : vector<16x1xf32>
    %c0_37 = arith.constant 0 : index
    %c0_38 = arith.constant 0 : index
    %122 = vector.load %arg8[%c0_37, %c0_38] : memref<16x1xf32, #tpu.memory_space<vmem>>, vector<16x1xf32>
    %123 = arith.addf %122, %121 : vector<16x1xf32>
    %c0_39 = arith.constant 0 : index
    %c0_40 = arith.constant 0 : index
    %124 = vector.load %arg8[%c0_39, %c0_40] : memref<16x1xf32, #tpu.memory_space<vmem>>, vector<16x1xf32>
    tpu.vector_store %arg8[%c0_39, %c0_40], %123 {strides = array<i32>} : memref<16x1xf32, #tpu.memory_space<vmem>>, vector<16x1xf32>,
    %c0_41 = arith.constant 0 : index
    %c0_42 = arith.constant 0 : index
    %125 = vector.load %arg9[%c0_41, %c0_42] : memref<1x256xf32, #tpu.memory_space<vmem>>, vector<1x256xf32>
    %126 = arith.addf %8, %11 : vector<16x256xf32>
    %cst_43 = arith.constant dense<0.000000e+00> : vector<256xf32>
    %127 = vector.multi_reduction <add>, %126, %cst_43 [0] : vector<16x256xf32> to vector<256xf32>
    %128 = vector.shape_cast %127 : vector<256xf32> to vector<1x256xf32>
    %129 = arith.addf %125, %128 : vector<1x256xf32>
    %c0_44 = arith.constant 0 : index
    %c0_45 = arith.constant 0 : index
    %130 = vector.load %arg9[%c0_44, %c0_45] : memref<1x256xf32, #tpu.memory_space<vmem>>, vector<1x256xf32>
    tpu.vector_store %arg9[%c0_44, %c0_45], %129 {strides = array<i32>} : memref<1x256xf32, #tpu.memory_space<vmem>>, vector<1x256xf32>,
    %c1_i32 = arith.constant 1 : i32
    %131 = arith.cmpi eq, %arg1, %c1_i32 : i32
    %132 = arith.extui %131 : i1 to i32
    %c0_i32_46 = arith.constant 0 : i32
    %133 = arith.cmpi ne, %132, %c0_i32_46 : i32
    scf.if %133 {
      %c0_47 = arith.constant 0 : index
      %c0_48 = arith.constant 0 : index
      %134 = vector.load %arg8[%c0_47, %c0_48] : memref<16x1xf32, #tpu.memory_space<vmem>>, vector<16x1xf32>
      %135 = vector.shape_cast %134 : vector<16x1xf32> to vector<1x16x1xf32>
      %cst_49 = arith.constant dense<0.000000e+00> : vector<1xf32>
      %136 = vector.multi_reduction <add>, %135, %cst_49 [1, 2] : vector<1x16x1xf32> to vector<1xf32>
      %137 = vector.shape_cast %136 : vector<1xf32> to vector<1x1x1xf32>
      %138 = vector.extract %137[0, 0, 0] : f32 from vector<1x1x1xf32>
      %139 = vector.broadcast %138 : f32 to vector<1x1x128xf32>
      %c0_50 = arith.constant 0 : index
      %c0_51 = arith.constant 0 : index
      %c0_52 = arith.constant 0 : index
      %140 = vector.load %arg6[%c0_50, %c0_51, %c0_52] : memref<1x1x128xf32, #tpu.memory_space<vmem>>, vector<1x1x128xf32>
      tpu.vector_store %arg6[%c0_50, %c0_51, %c0_52], %139 {strides = array<i32>} : memref<1x1x128xf32, #tpu.memory_space<vmem>>, vector<1x1x128xf32>,
      %c0_53 = arith.constant 0 : index
      %c0_54 = arith.constant 0 : index
      %141 = vector.load %arg9[%c0_53, %c0_54] : memref<1x256xf32, #tpu.memory_space<vmem>>, vector<1x256xf32>
      %142 = vector.shape_cast %141 : vector<1x256xf32> to vector<1x1x256xf32>
      %c0_55 = arith.constant 0 : index
      %c0_56 = arith.constant 0 : index
      %c0_57 = arith.constant 0 : index
      %143 = vector.load %arg7[%c0_55, %c0_56, %c0_57] : memref<1x1x256xf32, #tpu.memory_space<vmem>>, vector<1x1x256xf32>
      tpu.vector_store %arg7[%c0_55, %c0_56, %c0_57], %142 {strides = array<i32>} : memref<1x1x256xf32, #tpu.memory_space<vmem>>, vector<1x1x256xf32>,
    } else {
    }
    return
  }
  func.func @transform_0(%arg0: i32, %arg1: i32) -> i32 {
    %c0_i32 = arith.constant 0 : i32
    %c0_i32_0 = arith.constant 0 : i32
    return %c0_i32 : i32
  }
  func.func @transform_1(%arg0: i32, %arg1: i32) -> (i32, i32, i32) {
    %c2_i32 = arith.constant 2 : i32
    %0 = arith.muli %arg0, %c2_i32 : i32
    %1 = arith.addi %0, %arg1 : i32
    %c0_i32 = arith.constant 0 : i32
    %c0_i32_0 = arith.constant 0 : i32
    %c0_i32_1 = arith.constant 0 : i32
    return %c0_i32, %1, %c0_i32_0 : i32, i32, i32
  }
  func.func @transform_2(%arg0: i32, %arg1: i32) -> (i32, i32, i32) {
    %c2_i32 = arith.constant 2 : i32
    %0 = arith.muli %arg0, %c2_i32 : i32
    %1 = arith.addi %0, %arg1 : i32
    %c0_i32 = arith.constant 0 : i32
    %c0_i32_0 = arith.constant 0 : i32
    %c0_i32_1 = arith.constant 0 : i32
    return %c0_i32, %1, %c0_i32_0 : i32, i32, i32
  }
  func.func @transform_3(%arg0: i32, %arg1: i32) -> (i32, i32) {
    %c0_i32 = arith.constant 0 : i32
    %c0_i32_0 = arith.constant 0 : i32
    %c0_i32_1 = arith.constant 0 : i32
    return %c0_i32, %c0_i32_0 : i32, i32
  }
  func.func @transform_4(%arg0: i32, %arg1: i32) -> (i32, i32, i32) {
    %c0_i32 = arith.constant 0 : i32
    %c0_i32_0 = arith.constant 0 : i32
    %c0_i32_1 = arith.constant 0 : i32
    return %arg0, %c0_i32, %c0_i32_0 : i32, i32, i32
  }
  func.func @transform_5(%arg0: i32, %arg1: i32) -> (i32, i32, i32) {
    %c0_i32 = arith.constant 0 : i32
    %c0_i32_0 = arith.constant 0 : i32
    %c0_i32_1 = arith.constant 0 : i32
    return %arg0, %c0_i32, %c0_i32_0 : i32, i32, i32
  }
}

</mosaic_0001>

<bundles_post_ra>
// kernel: tpu_custom_call.1
= control target key start
LH: loop header
LB: loop body
LE: loop exit
PB: predicated region body
PF: predicated region fallthrough
CT: control target
= control target key end

     0   :  { %s2005_s0 = inlined_call_operand.hbm [shape: f32[2], index: 0, kind: input, shape index: {}]   ;;  %s2006_s1 = inlined_call_operand.hbm [shape: bf16[4,64,256], index: 1, kind: input, shape index: {}]   ;;  %s2007_s2 = inlined_call_operand.hbm [shape: bf16[2,64,256], index: 2, kind: input, shape index: {}]   ;;  %s2008_s3 = inlined_call_operand.vmem [shape: f32[1,256], index: 3, kind: input, shape index: {}]   ;;  %s2009_s4 = inlined_call_operand.hbm [shape: f32[2,1,128], index: 4, kind: output, shape index: {0}]   ;;  %s2010_s5 = inlined_call_operand.hbm [shape: f32[2,1,256], index: 5, kind: output, shape index: {1}]  }
   0x1   :  { %2017 = sst [smem:[#allocation32_spill]] %s2005_s0 }
   0x2   :  { %2018 = sst [smem:[#allocation33_spill]] %s2006_s1 }
   0x3   :  { %2019 = sst [smem:[#allocation34_spill]] %s2010_s5 }
   0x4   :  { %11 = vsyncpa [#allocation7], 0 }
   0x5   :  { %12 = vsyncpa [#allocation5], 0 }
   0x6   :  { %14 = vsyncpa [#allocation5 + $0x1], 0 }
   0x7   :  { %15 = vsyncpa [#allocation10], 0 }
   0x8   :  { %17 = vsyncpa [#allocation10 + $0x1], 0 }
   0x9   :  { %18 = vsyncpa [#allocation6], 0 }
   0xa   :  { %20 = vsyncpa [#allocation6 + $0x1], 0 }
   0xb   :  { %21 = vsyncpa [#allocation13], 0 }
   0xc   :  { %23 = vsyncpa [#allocation13 + $0x1], 0  ;;  %s1474_s18 = smov 0   ;;  %s1476_s19 = smov 0  }
   0xd   :  { %s1478_s20 = smov 0   ;;  %s1480_s21 = smov 0  }
   0xe   :  { %s1482_s22 = smov 0   ;;  %s1484_s23 = smov 0  }
   0xf   :  { %s1486_s24 = smov 0   ;;  %s1488_s25 = smov 0  }
  0x10   :  { %s1490_s26 = smov 0   ;;  %s1492_s27 = smov 0  }
  0x11   :  { %s1494_s28 = smov 0  }
  0x12 LB: > { %2020 = sst [smem:[#allocation25_spill]] %s1405_s23  ;;  %s983_s29 = sadd.s32 4294967295, %s1425_s28   ;;  %s1425_s28 = sphi %s1494_s28, %s29_s28   ;;  %s1421_s27 = sphi %s1492_s27, %s2046_s27   ;;  %s1417_s26 = sphi %s1490_s26, %s2052_s26   ;;  %s1413_s25 = sphi %s1488_s25, %s2044_s25   ;;  %s1409_s24 = sphi %s1486_s24, %s2043_s24   ;;  %s1405_s23 = sphi %s1484_s23, %s2042_s23   ;;  %s1401_s22 = sphi %s1482_s22, %s2051_s22   ;;  %s1397_s21 = sphi %s1480_s21, %s2050_s21   ;;  %s1393_s20 = sphi %s1478_s20, %s2049_s20   ;;  %s1389_s19 = sphi %s1476_s19, %s2048_s19   ;;  %s1385_s18 = sphi %s1474_s18, %s2047_s18  }
  0x13   : > { %2021 = sst [smem:[#allocation26_spill]] %s1417_s26  ;;  %s38_s6 = sadd.s32 1, %s1417_s26 }
  0x14   : > { %2022 = sst [smem:[#allocation27_spill]] %s1421_s27  ;;  %s41_s7 = sadd.s32 1, %s1421_s27 }
  0x15   : > { %p39_p0 = scmp.ge.s32.totalorder %s38_s6, 2  ;;  %s985_s8 = sshll.u32 %s1421_s27, 1 }
  0x16   : > { %s1533_s9 = sadd.s32 %s1417_s26, %s985_s8  ;;  %s73_s10 = sadd.s32 1, %s1405_s23 }
  0x17   : > { %s2054_s6 = smov (%p39_p0, %s38_s6), 0  ;;  %s2056_s7 = smov (!%p39_p0, %s41_s7), %s1421_s27 }
  0x18   : > { %2023 = sst [smem:[#allocation28_spill]] %s2054_s6  ;;  %p80_p1 = scmp.ne.s32.totalorder %s1405_s23, %s1401_s22 }
  0x19   : > { %p81_p2 = scmp.eq.s32.totalorder %s1425_s28, 0  ;;  %p43_p3 = scmp.ge.s32.totalorder %s2056_s7, 2 }
  0x1a   : > { %p86_p4 = scmp.ne.s32.totalorder %s1401_s22, %s1397_s21  ;;  %p1547_p6 = scmp.eq.s32.totalorder %s983_s29, 0 }
  0x1b   : > { %p1543_p5 = por %p81_p2, %p80_p1  ;;  %s2058_s7 = smov (%p43_p3, %s2056_s7), 0 }
  0x1c   : > { %2026 = sst [smem:[#allocation29_spill]] %s2058_s7  ;;  %p1555_p7 = por %p1547_p6, %p86_p4 }
  0x1d   : > { %s150_s14 = sadd.s32 1, %s1393_s20  ;;  %s986_s15 = sshll.u32 %s2058_s7, 1 }
  0x1e   : > { %s147_s16 = ssub.s32 %s1421_s27, %s2058_s7  ;;  %s69_s17 = sadd.s32 %s986_s15, %s2054_s6 }
  0x1f   : > { %p148_p8 = scmp.eq.s32.totalorder %s147_s16, 0  ;;  %s70_s21 = ssub.s32 %s1533_s9, %s69_s17 }
  0x20   : > { %p160_p9 = scmp.ne.s32.totalorder %s1393_s20, %s1389_s19  ;;  %p71_p10 = scmp.eq.s32.totalorder %s70_s21, 0 }
  0x21   : > { %p161_p11 = scmp.eq.s32.totalorder %s983_s29, 3  ;;  %p166_p13 = scmp.ne.s32.totalorder %s1389_s19, %s1385_s18 }
  0x22   : > { %s1568_s8 = scalar_select %p148_p8, %s1393_s20, %s150_s14  }
  0x23   : > { %s1571_s30 = scalar_select %p71_p10, %s1405_s23, %s73_s10  }
  0x24   : > { %2028 = sst [smem:[#allocation30_spill]] %s1568_s8  ;;  %p1573_p12 = por %p161_p11, %p160_p9 }
  0x25   : > { %2029 = sst [smem:[#allocation31_spill]] %s1571_s30  ;;  %s2031_s5 = sadd.s32 4294967294, %s1425_s28  }
  0x26   : > { %p167_p0 = scmp.eq.s32.totalorder %s2031_s5, 3  ;;  %p989_p1 = scmp.ge.s32.totalorder %s1425_s28, 1 }
  0x27   : > { %p200_p2 = scmp.lt.s32.totalorder %s1425_s28, 5  ;;  %s2034_s0 = sld [smem:[#allocation32_spill]] }
  0x28   : > { %p1583_p3 = por %p167_p0, %p166_p13 }
  0x29   : > { %p1587_p4 = pnand %p989_p1, %p200_p2 }
  0x2b   : > { %p1061_p8 = pneg %p1587_p4 }
  0x2d   : > { %p1062_p9 = pnand %p1061_p8, %p1547_p6  ;;  %s1250_s14 = scalar_lea.hbm %s2034_s0, 16 }
  0x2e   : > { %p1251_p10 = scmp.ne.s32.totalorder %s2034_s0, %s1250_s14  ;;  %p1257_p1 = scmp.lt.u32.totalorder %s1250_s14, %s2034_s0 }
  0x2f   : > { %p1252_p11 = pneg %p1062_p9 }
  0x31   : > { %p1253_p13 = pnand %p1252_p11, %p1251_p10 }
  0x33   : > { %p1254_p0 = pneg %p1253_p13 }
  0x35   : > { %p1259_p2 = pnand %p1257_p1, %p1254_p0 }
  0x37   : > { %1262 = shalt.err (!%p1259_p2)
}
  0x38   : > { %s1427_s6 = smov [#allocation4]   ;;  %p991_p8 = scmp.ge.s32.totalorder %s1425_s28, 4 }
  0x39   : > { %1064 = dma.hbm_to_smem (!%p1062_p9), %s2034_s0, 16, %s1427_s6, [#allocation7]  }
  0x3a   : > { %221 = sbr.rel (%p991_p8) target bundleno = 91 (0x5b), region = 24 }
  0x41   : > { %s1609_s29 = sand.u32 1, %s1405_s23   ;;  %s1029_s7 = sshll.u32 %s1533_s9, 8 }
  0x42   : > { %s992_s10 = sshll.u32 %s1609_s29, 6  ;;  %s2035_s1 = sld [smem:[#allocation33_spill]] }
  0x43   : > { %s1037_s30 = scalar_select %p1543_p5, [#allocation0], [#allocation18] }
  0x44   : > { %s229_s6 = scalar_lea.vmem [#allocation8], %s992_s10  ;;  %s1428_s0 = smov 1024  }
  0x45   : > { %s251_s17 = sshll.u32 %s229_s6, 4  ;;  %s243_s21 = sld [smem:[%s1037_s30]]   ;;  %s252_s17 = int_to_ptr.vmem [resolvable:$true] %s251_s17 }
  0x46   : > { %1038 = sst [smem:[#allocation15]] (%p1543_p5), %s1428_s0  ;;  %s1429_s23 = smov 256  }
  0x47   : > { %1039 = sst [smem:[#allocation15 + $0x1]] (%p1543_p5), %s1429_s23  ;;  %s1430_s9 = smov 2  }
  0x48   : > { %s238_s27 = scalar_lea.hbm %s2035_s1, %s1029_s7  ;;  %1040 = sst [smem:[#allocation15 + $0x2]] (%p1543_p5), %s1430_s9 }
  0x49   : > { %s1431_s14 = smov 128   ;;  %s1432_s5 = smov 8  }
  0x4a   : > { %1041 = sst [smem:[#allocation15 + $0x3]] (%p1543_p5), %s1431_s14  ;;  %s226_s6 = scalar_lea.sflag [#allocation5], %s1609_s29 }
  0x4b   : > { %1042 = sst [smem:[#allocation15 + $0x4]] (%p1543_p5), %s1431_s14  ;;  %s997_s10 = sshll.u32 %s243_s21, 26 }
  0x4c   : > { %1043 = sst [smem:[#allocation15 + $0x5]] (%p1543_p5), %s1432_s5  ;;  %s998_s30 = sadd.s32 134217728, %s997_s10 }
  0x4d   : > { %s1433_s1 = smov [#allocation14]  }
  0x4e   : > { %1044 = dma.general (%p1543_p5), %s238_s27, 1024, %s252_s17, %s226_s6, %s1433_s1, [#allocation15], %s998_s30, 0  }
  0x4f   : > { %s999_s0 = sshll.u32 %s1609_s29, 5  ;;  %s287_s21 = scalar_lea.hbm %s2007_s2, %s1029_s7 }
  0x50   : > { %s1045_s14 = scalar_select %p1543_p5, [#allocation0], [#allocation19] }
  0x51   : > { %s278_s10 = scalar_lea.vmem [#allocation9], %s999_s0  ;;  %s1434_s1 = smov 1024  }
  0x52   : > { %s300_s5 = sshll.u32 %s278_s10, 4  ;;  %s292_s8 = sld [smem:[%s1045_s14]]   ;;  %s301_s5 = int_to_ptr.vmem [resolvable:$true] %s300_s5 }
  0x53   : > { %1046 = sst [smem:[#allocation17]] (%p1543_p5), %s1434_s1  ;;  %s1435_s27 = smov 256  }
  0x54   : > { %1047 = sst [smem:[#allocation17 + $0x1]] (%p1543_p5), %s1435_s27  ;;  %s1436_s17 = smov 2  }
  0x55   : > { %1048 = sst [smem:[#allocation17 + $0x2]] (%p1543_p5), %s1436_s17  ;;  %s1437_s30 = smov 128  }
  0x56   : > { %1049 = sst [smem:[#allocation17 + $0x3]] (%p1543_p5), %s1437_s30  ;;  %s1438_s6 = smov 8  }
  0x57   : > { %1050 = sst [smem:[#allocation17 + $0x4]] (%p1543_p5), %s1437_s30  ;;  %s275_s23 = scalar_lea.sflag [#allocation10], %s1609_s29 }
  0x58   : > { %s1004_s7 = sshll.u32 %s292_s8, 26  ;;  %1051 = sst [smem:[#allocation17 + $0x5]] (%p1543_p5), %s1438_s6 }
  0x59   : > { %s1005_s0 = sadd.s32 134217728, %s1004_s7  ;;  %s1439_s9 = smov [#allocation16]  }
  0x5a   : > { %1052 = dma.general (%p1543_p5), %s287_s21, 512, %s301_s5, %s275_s23, %s1439_s9, [#allocation17], %s1005_s0, 0  }
  0x5b PF: > { %325 = sbr.rel (%p1587_p4) target bundleno = 887 (0x377), region = 36 }
  0x62   : > { %1364 = dma.done.wait (%p1547_p6), [#allocation7], 16  }
  0x63   : > { %1366 = vsyncadd (%p1547_p6), [#allocation7], 4294967280  ;;  %s331_s8 = sand.u32 1, %s1401_s22  }
  0x64   : > { %s1008_s14 = sshll.u32 %s331_s8, 6  ;;  %s332_s10 = scalar_lea.sflag [#allocation5], %s331_s8 }
  0x65   : > { %s1661_s1 = scalar_lea.vmem [#allocation8], %s1008_s14 }
  0x66   : > { %1368 = dma.done.wait (%p1555_p7), %s332_s10, 1024  }
  0x67   : > { %1370 = vsyncadd (%p1555_p7), %s332_s10, 4294966272  ;;  %s1009_s11 = sshll.u32 %s331_s8, 5  ;;  %s341_s16 = scalar_lea.sflag [#allocation10], %s331_s8 }
  0x68   : > { %s344_s29 = scalar_lea.vmem [#allocation9], %s1009_s11 }
  0x69   : > { %1372 = dma.done.wait (%p1555_p7), %s341_s16, 512  }
  0x6a   : > { %1374 = vsyncadd (%p1555_p7), %s341_s16, 4294966784 }
  0x6b   : > { %349 = sfence }
  0x6c   : > { %s1672_s12 = sand.u32 1, %s1389_s19   ;;  %s1674_s21 = sld [smem:[#allocation4]] }
  0x6d   : > { %s1010_s5 = sshll.u32 %s1672_s12, 1  ;;  %s1011_s27 = sld [smem:[#allocation4 + $0x1]] }
  0x6e   : > { %s373_s17 = scalar_lea.vmem [#allocation11], %s1672_s12  ;;  %s1678_s30 = scalar_lea.vmem [#allocation12], %s1010_s5 }
  0x6f   : > { %p1012_p5 = scmp.ne.s32.totalorder %s1409_s24, 0 }
  0x70   : > { %vm393_vm0 = vcmask (!%p1012_p5), 7168   ;;  %v396_v0 = vlaneseq (!%p1012_p5)  ;;  %v1440_v1 = vmov (!%p1012_p5), 0.0  }
  0x71   : > { %392 = sbr.rel (%p1012_p5) target bundleno = 120 (0x78), region = 52  ;;  %394 = vst.msk [vmem:[#allocation2] sm:$0xff] (!%p1012_p5), %vm393_vm0, %v1440_v1  ;;  %395 = vst.msk [vmem:[#allocation2 + $0x8] sm:$0xff] (!%p1012_p5), %vm393_vm0, %v1440_v1 }
  0x72   : > { %vm398_vm1 = vcmp.lt.s32.totalorder (!%p1012_p5), %v396_v0, 256 }
  0x73   : > { %400 = vst.msk [vmem:[#allocation3] sm:$0x3] (!%p1012_p5), %vm398_vm1, %v1440_v1 }
  0x78 PF: > { %v402_v2 = vld [vmem:[%s344_s29] sm:$0xff]  ;;  %v416_v3 = vlaneseq  ;;  %v1013_v4 = vld [vmem:[%s344_s29 + $0x10] sm:$0xff]  ;;  %v403_v7 = vld [vmem:[%s344_s29 + $0x8] sm:$0xff]  ;;  %v430_v11 = vstv %s1011_s27  ;;  %v1441_v20 = vmov 1966171168   ;;  %vm735_vm3 = vcmask 7168  }
  0x79   : > { %v404_v5 = vunpack.c.l.bf16 %v402_v2  ;;  %v411_v6 = vunpack.c.l.bf16 %v1013_v4  ;;  %v1014_v8 = vld [vmem:[%s344_s29 + $0x18] sm:$0xff]  ;;  %v405_v9 = vunpack.c.h.bf16 %v402_v2  ;;  %v507_v12 = vld [vmem:[%s1661_s1] sm:$0xff]  ;;  %v412_v14 = vunpack.c.h.bf16 %v1013_v4  ;;  %v508_v23 = vld [vmem:[%s1661_s1 + $0x8] sm:$0xff]  ;;  %p1021_p6 = scmp.ne.s32.totalorder %s1409_s24, 1 }
  0x7a   : > { %v1682_v10 = vshrl.u32 %v416_v3, 7  ;;  %v401_v13 = vld [vmem:[%s2008_s3] sm:$0x3]  ;;  %v406_v16 = vunpack.c.l.bf16 %v403_v7  ;;  %v413_v17 = vunpack.c.l.bf16 %v1014_v8  ;;  %v1690_v21 = vunpack.c.l.s4 %v1441_v20  ;;  %v1015_v52 = vld [vmem:[%s1661_s1 + $0x10] sm:$0xff]  ;;  %v1016_v57 = vld [vmem:[%s1661_s1 + $0x18] sm:$0xff] }
  0x7b   : > { %v739_v15 = vadd.f32 %v411_v6, %v404_v5  ;;  %v407_v22 = vunpack.c.h.bf16 %v403_v7  ;;  %v740_v24 = vadd.f32 %v412_v14, %v405_v9  ;;  %v414_v25 = vunpack.c.h.bf16 %v1014_v8  ;;  %v1017_v62 = vld [vmem:[%s1661_s1 + $0x20] sm:$0xff] }
  0x7c   : > { %v418_v18 = vsub.s32 0, %v1682_v10  ;;  %v422_v19 = vsub.s32 1, %v1682_v10  ;;  %v741_v26 = vadd.f32 %v413_v17, %v406_v16  ;;  %v509_v27 = vunpack.c.l.bf16 %v507_v12 }
  0x7d   : > { %v510_v30 = vunpack.c.h.bf16 %v507_v12  ;;  %v1694_v31 = vstv %s1674_s21  ;;  %v742_v32 = vadd.f32 %v414_v25, %v407_v22  ;;  %v511_v35 = vunpack.c.l.bf16 %v508_v23 }
  0x7e   : > { %v419_v28 = vrot.slane %v401_v13, %v418_v18  ;;  %v423_v29 = vrot.slane %v401_v13, %v422_v19  ;;  %v743_v33 = vadd.f32 %v741_v26, %v739_v15  ;;  %v1697_v34 = vmul.f32 %v1694_v31, %v509_v27  ;;  %v1018_v13 = vld [vmem:[%s1661_s1 + $0x28] sm:$0xff] }
  0x7f   : > { %v750_v56 = vadd.f32 %v742_v32, %v740_v24  ;;  %v1726_v60 = vmul.f32 %v1694_v31, %v510_v30  ;;  %v512_v61 = vunpack.c.h.bf16 %v508_v23  ;;  %v1730_v1 = vmul.f32 %v1694_v31, %v511_v35  ;;  %v1019_v23 = vld [vmem:[%s1661_s1 + $0x30] sm:$0xff] }
  0x80   : > { %v426_v36 = vsub.f32 %v404_v5, %v419_v28  ;;  %v427_v37 = vsub.f32 %v405_v9, %v423_v29  ;;  %v465_v38 = vsub.f32 %v411_v6, %v419_v28  ;;  %v466_v39 = vsub.f32 %v412_v14, %v423_v29 }
  0x81   : > { %v428_v40 = vsub.f32 %v406_v16, %v419_v28  ;;  %v429_v41 = vsub.f32 %v407_v22, %v423_v29  ;;  %v467_v42 = vsub.f32 %v413_v17, %v419_v28  ;;  %v468_v43 = vsub.f32 %v414_v25, %v423_v29  ;;  %v1020_v28 = vld [vmem:[%s1661_s1 + $0x38] sm:$0xff] }
  0x82   : > { %v1699_v44 = vmul.f32 %v430_v11, %v426_v36  ;;  %v1701_v45 = vmul.f32 %v430_v11, %v427_v37  ;;  %v1703_v46 = vmul.f32 %v465_v38, %v430_v11  ;;  %v1705_v47 = vmul.f32 %v466_v39, %v430_v11 }
  0x83   : > { %v1707_v48 = vmul.f32 %v430_v11, %v428_v40  ;;  %v1709_v49 = vmul.f32 %v430_v11, %v429_v41  ;;  %v1711_v50 = vmul.f32 %v467_v42, %v430_v11  ;;  %v1713_v51 = vmul.f32 %v468_v43, %v430_v11 }
  0x84   : > { %v435_v53 = vmax.f32 %v1699_v44, %v1701_v45  ;;  %v473_v54 = vmax.f32 %v1703_v46, %v1705_v47  ;;  %v744_v55 = vrot.slane %v743_v33, 4  ;;  %v751_v0 = vrot.slane %v750_v56, 4 }
  0x85   : > { %v438_v58 = vmax.f32 %v1707_v48, %v1709_v49  ;;  %v476_v59 = vmax.f32 %v1711_v50, %v1713_v51  ;;  %v565_v2 = vunpack.c.l.bf16 %v1015_v52  ;;  %v1733_v4 = vmul.f32 %v1694_v31, %v512_v61  ;;  %v738_v61 = vld [vmem:[#allocation3] sm:$0x3] }
  0x86   : > { %436 = vmax.xlane.f32.xlu0 %v435_v53  ;;  %474 = vmax.xlane.f32.xlu1 %v473_v54  ;;  %v745_v63 = vadd.f32 %v744_v55, %v743_v33  ;;  %v566_v5 = vunpack.c.h.bf16 %v1015_v52  ;;  %v567_v6 = vunpack.c.l.bf16 %v1016_v57  ;;  %v568_v7 = vunpack.c.h.bf16 %v1016_v57 }
  0x87   : > { %v752_v9 = vadd.f32 %v751_v0, %v750_v56  ;;  %v1736_v11 = vmul.f32 %v565_v2, %v1694_v31  ;;  %v620_v12 = vunpack.c.l.bf16 %v1017_v62  ;;  %v518_v14 = vmax.f32 %v1697_v34, %v1726_v60 }
  0x88   : > { %v746_v8 = vrot.slane %v745_v63, 2  ;;  %v521_v15 = vmax.f32 %v1730_v1, %v1733_v4  ;;  %v1744_v16 = vmul.f32 %v566_v5, %v1694_v31  ;;  %v1747_v17 = vmul.f32 %v567_v6, %v1694_v31 }
  0x89   : > { %v753_v19 = vrot.slane %v752_v9, 2  ;;  %v1750_v20 = vmul.f32 %v568_v7, %v1694_v31  ;;  %v621_v22 = vunpack.c.h.bf16 %v1017_v62  ;;  %v762_v24 = vunpack.c.0.s8 %v1690_v21 }
  0x8a   : > { %439 = vmax.xlane.f32.xlu0 %v438_v58  ;;  %v747_v18 = vadd.f32 %v746_v8, %v745_v63  ;;  %477 = vmax.xlane.f32.xlu1 %v476_v59  ;;  %v1755_v25 = vmul.f32 %v620_v12, %v1694_v31  ;;  %v622_v26 = vunpack.c.l.bf16 %v1018_v13  ;;  %v623_v27 = vunpack.c.h.bf16 %v1018_v13 }
  0x8b   : > { %v754_v30 = vadd.f32 %v753_v19, %v752_v9  ;;  %v573_v32 = vmax.f32 %v1736_v11, %v1744_v16  ;;  %v1761_v33 = vmul.f32 %v621_v22, %v1694_v31  ;;  %v677_v21 = vunpack.c.l.bf16 %v1019_v23 }
  0x8c   : > { %v748_v29 = vrot.slane %v747_v18, 1  ;;  %v1764_v35 = vmul.f32 %v622_v26, %v1694_v31  ;;  %v1767_v36 = vmul.f32 %v623_v27, %v1694_v31  ;;  %v678_v37 = vunpack.c.h.bf16 %v1019_v23 }
  0x8d   : > { %v755_v39 = vrot.slane %v754_v30, 1  ;;  %v576_v40 = vmax.f32 %v1747_v17, %v1750_v20  ;;  %v679_v41 = vunpack.c.l.bf16 %v1020_v28  ;;  %v680_v42 = vunpack.c.h.bf16 %v1020_v28 }
  0x8e   : > { %v749_v38 = vadd.f32 %v748_v29, %v747_v18  ;;  %519 = vmax.xlane.f32.xlu0 %v518_v14  ;;  %522 = vmax.xlane.f32.xlu1 %v521_v15  ;;  %v765_v43 = vsub.s32 %v762_v24, %v1682_v10  ;;  %v628_v53 = vmax.f32 %v1755_v25, %v1761_v33  ;;  %vm1793_vm2 = vcmp.lt.s32.totalorder %v416_v3, 256 }
  0x8f   : > { %v756_v52 = vadd.f32 %v755_v39, %v754_v30  ;;  %v631_v54 = vmax.f32 %v1764_v35, %v1767_v36  ;;  %v1777_v55 = vmul.f32 %v677_v21, %v1694_v31  ;;  %v1780_v56 = vmul.f32 %v678_v37, %v1694_v31 }
  0x90   : > { %v1783_v58 = vmul.f32 %v679_v41, %v1694_v31  ;;  %v1786_v10 = vmul.f32 %v680_v42, %v1694_v31 }
  0x91   : > { %v759_v57 = vcombine.low %v749_v38, %v756_v52  ;;  %v685_v63 = vmax.f32 %v1777_v55, %v1780_v56 }
  0x92   : > { %574 = vmax.xlane.f32.xlu0 %v573_v32  ;;  %577 = vmax.xlane.f32.xlu1 %v576_v40  ;;  %v688_v0 = vmax.f32 %v1783_v58, %v1786_v10 }
  0x93   : > { %v766_v59 = vrot.slane %v759_v57, %v765_v43 }
  0x95   : > { %v773_v62 = vrot.slane %v766_v59, %v765_v43 }
  0x96   : > { %629 = vmax.xlane.f32.xlu0 %v628_v53  ;;  %632 = vmax.xlane.f32.xlu1 %v631_v54 }
  0x97   : > { %v775_v5 = vadd.f32 %v773_v62, %v738_v61 }
  0x99   : > { %780 = vst.msk [vmem:[#allocation3] sm:$0x3] %vm1793_vm2, %v775_v5 }
  0x9a   : > { %686 = vmax.xlane.f32.xlu0 %v685_v63  ;;  %689 = vmax.xlane.f32.xlu1 %v688_v0 }
 0x113   : > { %v437_v31 = vpop.xlane.xlu0 %436  ;;  %v475_v6 = vpop.xlane.xlu1 %474 }
 0x114   : > { %v441_v7 = vsub.f32 %v1699_v44, %v437_v31  ;;  %v442_v8 = vsub.f32 %v1701_v45, %v437_v31  ;;  %v479_v9 = vsub.f32 %v1703_v46, %v475_v6  ;;  %v480_v12 = vsub.f32 %v1705_v47, %v475_v6 }
 0x116   : > { %v445_v3 = vmul.f32 1.442695, %v441_v7  ;;  %v447_v13 = vmul.f32 1.442695, %v442_v8  ;;  %v483_v14 = vmul.f32 1.442695, %v479_v9 }
 0x117   : > { %v485_v15 = vmul.f32 1.442695, %v480_v12  ;;  %v440_v18 = vpop.xlane.xlu0 %439  ;;  %v478_v19 = vpop.xlane.xlu1 %477 }
 0x118   : > { %1178 = vpow2.f32 %v445_v3  ;;  %v443_v22 = vsub.f32 %v1707_v48, %v440_v18  ;;  %v444_v23 = vsub.f32 %v1709_v49, %v440_v18  ;;  %v481_v24 = vsub.f32 %v1711_v50, %v478_v19 }
 0x119   : > { %1180 = vpow2.f32 %v447_v13  ;;  %v482_v44 = vsub.f32 %v1713_v51, %v478_v19 }
 0x11a   : > { %1182 = vpow2.f32 %v483_v14  ;;  %v449_v45 = vmul.f32 1.442695, %v443_v22  ;;  %v451_v46 = vmul.f32 1.442695, %v444_v23  ;;  %v487_v47 = vmul.f32 1.442695, %v481_v24 }
 0x11b   : > { %1184 = vpow2.f32 %v485_v15  ;;  %v489_v26 = vmul.f32 1.442695, %v482_v44  ;;  %v1807_v27 = vpop.xlane.xlu0 %519  ;;  %v1809_v28 = vpop.xlane.xlu1 %522 }
 0x11c   : > { %1186 = vpow2.f32 %v449_v45  ;;  %v524_v48 = vsub.f32 %v1697_v34, %v1807_v27  ;;  %v525_v49 = vsub.f32 %v1726_v60, %v1807_v27  ;;  %v526_v50 = vsub.f32 %v1730_v1, %v1809_v28 }
 0x11d   : > { %1188 = vpow2.f32 %v451_v46  ;;  %v527_v51 = vsub.f32 %v1733_v4, %v1809_v28 }
 0x11e   : > { %1190 = vpow2.f32 %v487_v47  ;;  %v528_v29 = vmul.f32 1.442695, %v524_v48  ;;  %v530_v30 = vmul.f32 1.442695, %v525_v49  ;;  %v532_v32 = vmul.f32 1.442695, %v526_v50 }
 0x11f   : > { %1192 = vpow2.f32 %v489_v26  ;;  %v534_v21 = vmul.f32 1.442695, %v527_v51  ;;  %v1819_v37 = vpop.xlane.xlu0 %574  ;;  %v1821_v38 = vpop.xlane.xlu1 %577 }
 0x120   : > { %1194 = vpow2.f32 %v528_v29  ;;  %v579_v39 = vsub.f32 %v1736_v11, %v1819_v37  ;;  %v580_v40 = vsub.f32 %v1744_v16, %v1819_v37  ;;  %v581_v41 = vsub.f32 %v1747_v17, %v1821_v38 }
 0x121   : > { %1196 = vpow2.f32 %v530_v30  ;;  %v582_v42 = vsub.f32 %v1750_v20, %v1821_v38 }
 0x122   : > { %v1831_v43 = vpop.eup %1178  ;;  %1198 = vpow2.f32 %v532_v32  ;;  %v583_v52 = vmul.f32 1.442695, %v579_v39  ;;  %v585_v53 = vmul.f32 1.442695, %v580_v40  ;;  %v587_v54 = vmul.f32 1.442695, %v581_v41 }
 0x123   : > { %v1833_v57 = vpop.eup %1180  ;;  %1200 = vpow2.f32 %v534_v21  ;;  %v589_v59 = vmul.f32 1.442695, %v582_v42  ;;  %v1835_v61 = vpop.xlane.xlu0 %629 }
 0x124   : > { %v1837_v62 = vpop.xlane.xlu1 %632  ;;  %v1839_v63 = vpop.eup %1182  ;;  %1202 = vpow2.f32 %v583_v52  ;;  %v634_v0 = vsub.f32 %v1755_v25, %v1835_v61  ;;  %v635_v5 = vsub.f32 %v1761_v33, %v1835_v61  ;;  %v453_v31 = vadd.f32 %v1833_v57, %v1831_v43 }
 0x125   : > { %v1847_v6 = vpop.eup %1184  ;;  %1204 = vpow2.f32 %v585_v53  ;;  %v636_v7 = vsub.f32 %v1764_v35, %v1837_v62  ;;  %v637_v8 = vsub.f32 %v1767_v36, %v1837_v62 }
 0x126   : > { %v1853_v9 = vpop.eup %1186  ;;  %1206 = vpow2.f32 %v587_v54  ;;  %v638_v12 = vmul.f32 1.442695, %v634_v0  ;;  %v640_v3 = vmul.f32 1.442695, %v635_v5  ;;  %454 = vadd.xlane.f32.xlu0 %v453_v31  ;;  %v491_v13 = vadd.f32 %v1847_v6, %v1839_v63 }
 0x127   : > { %v1857_v14 = vpop.eup %1188  ;;  %1208 = vpow2.f32 %v589_v59  ;;  %v642_v15 = vmul.f32 1.442695, %v636_v7  ;;  %v644_v18 = vmul.f32 1.442695, %v637_v8  ;;  %v1859_v19 = vpop.xlane.xlu0 %686 }
 0x128   : > { %v1861_v22 = vpop.xlane.xlu1 %689  ;;  %v1863_v23 = vpop.eup %1190  ;;  %1210 = vpow2.f32 %v638_v12  ;;  %v691_v24 = vsub.f32 %v1777_v55, %v1859_v19  ;;  %v692_v44 = vsub.f32 %v1780_v56, %v1859_v19  ;;  %v456_v45 = vadd.f32 %v1857_v14, %v1853_v9 }
 0x129   : > { %v1871_v46 = vpop.eup %1192  ;;  %1212 = vpow2.f32 %v640_v3  ;;  %v693_v47 = vsub.f32 %v1783_v58, %v1861_v22  ;;  %v694_v26 = vsub.f32 %v1786_v10, %v1861_v22 }
 0x12a   : > { %v1195_v48 = vpop.eup %1194  ;;  %1214 = vpow2.f32 %v642_v15  ;;  %v695_v49 = vmul.f32 1.442695, %v691_v24  ;;  %v697_v50 = vmul.f32 1.442695, %v692_v44  ;;  %492 = vadd.xlane.f32.xlu0 %v491_v13  ;;  %457 = vadd.xlane.f32.xlu1 %v456_v45  ;;  %v494_v51 = vadd.f32 %v1871_v46, %v1863_v23 }
 0x12b   : > { %v1197_v29 = vpop.eup %1196  ;;  %1216 = vpow2.f32 %v644_v18  ;;  %v699_v30 = vmul.f32 1.442695, %v693_v47  ;;  %v701_v32 = vmul.f32 1.442695, %v694_v26 }
 0x12c   : > { %v1199_v21 = vpop.eup %1198  ;;  %1218 = vpow2.f32 %v695_v49  ;;  %v536_v39 = vadd.f32 %v1197_v29, %v1195_v48 }
 0x12d   : > { %v1201_v40 = vpop.eup %1200  ;;  %1220 = vpow2.f32 %v697_v50 }
 0x12e   : > { %v1203_v41 = vpop.eup %1202  ;;  %1222 = vpow2.f32 %v699_v30  ;;  %495 = vadd.xlane.f32.xlu1 %v494_v51  ;;  %537 = vadd.xlane.f32.xlu0 %v536_v39  ;;  %v539_v42 = vadd.f32 %v1201_v40, %v1199_v21 }
 0x12f   : > { %v1205_v52 = vpop.eup %1204  ;;  %1224 = vpow2.f32 %v701_v32 }
 0x130   : > { %v1207_v53 = vpop.eup %1206  ;;  %v591_v54 = vadd.f32 %v1205_v52, %v1203_v41 }
 0x131   : > { %v1209_v59 = vpop.eup %1208 }
 0x132   : > { %v1211_v0 = vpop.eup %1210  ;;  %540 = vadd.xlane.f32.xlu1 %v539_v42  ;;  %592 = vadd.xlane.f32.xlu0 %v591_v54  ;;  %v594_v5 = vadd.f32 %v1209_v59, %v1207_v53 }
 0x133   : > { %v1213_v31 = vpop.eup %1212 }
 0x134   : > { %v1215_v7 = vpop.eup %1214  ;;  %v646_v8 = vadd.f32 %v1213_v31, %v1211_v0 }
 0x135   : > { %v1217_v12 = vpop.eup %1216 }
 0x136   : > { %v1219_v3 = vpop.eup %1218  ;;  %595 = vadd.xlane.f32.xlu1 %v594_v5  ;;  %647 = vadd.xlane.f32.xlu0 %v646_v8  ;;  %v649_v13 = vadd.f32 %v1217_v12, %v1215_v7 }
 0x137   : > { %v1221_v15 = vpop.eup %1220 }
 0x138   : > { %v1223_v18 = vpop.eup %1222  ;;  %v703_v24 = vadd.f32 %v1221_v15, %v1219_v3 }
 0x139   : > { %v1225_v44 = vpop.eup %1224 }
 0x13a   : > { %650 = vadd.xlane.f32.xlu1 %v649_v13  ;;  %704 = vadd.xlane.f32.xlu0 %v703_v24  ;;  %v706_v45 = vadd.f32 %v1225_v44, %v1223_v18 }
 0x13e   : > { %707 = vadd.xlane.f32.xlu1 %v706_v45 }
 0x1b3   : > { %v455_v47 = vpop.xlane.xlu0 %454 }
 0x1b4   : > { %1226 = vrcp.f32 %v455_v47 }
 0x1b7   : > { %v458_v26 = vpop.xlane.xlu1 %457  ;;  %v493_v48 = vpop.xlane.xlu0 %492 }
 0x1b8   : > { %1228 = vrcp.f32 %v458_v26 }
 0x1b9   : > { %1230 = vrcp.f32 %v493_v48 }
 0x1bb   : > { %v496_v49 = vpop.xlane.xlu1 %495 }
 0x1bc   : > { %1232 = vrcp.f32 %v496_v49 }
 0x1be   : > { %v1227_v50 = vpop.eup %1226 }
 0x1bf   : > { %v461_v30 = vmul.f32 %v1227_v50, %v1831_v43  ;;  %v462_v39 = vmul.f32 %v1227_v50, %v1833_v57  ;;  %v541_v15 = vpop.xlane.xlu1 %540 }
 0x1c1   : > { %v603_v59 = vmul.f32 %v1736_v11, %v461_v30 }
 0x1c2   : > { %v1229_v51 = vpop.eup %1228 }
 0x1c3   : > { %v1231_v29 = vpop.eup %1230  ;;  %v463_v52 = vmul.f32 %v1229_v51, %v1853_v9  ;;  %v464_v43 = vmul.f32 %v1229_v51, %v1857_v14  ;;  %v596_v18 = vpop.xlane.xlu1 %595 }
 0x1c4   : > { %v499_v32 = vmul.f32 %v1231_v29, %v1839_v63  ;;  %v500_v21 = vmul.f32 %v1231_v29, %v1847_v6  ;;  %v604_v6 = vmul.f32 %v1744_v16, %v462_v39 }
 0x1c6   : > { %v1233_v40 = vpop.eup %1232  ;;  %v548_v41 = vmul.f32 %v1697_v34, %v499_v32  ;;  %v549_v42 = vmul.f32 %v1726_v60, %v500_v21  ;;  %v503_v0 = vadd.f32 %v499_v32, %v461_v30  ;;  %v504_v57 = vadd.f32 %v500_v21, %v462_v39 }
 0x1c7   : > { %v501_v53 = vmul.f32 %v1233_v40, %v1863_v23  ;;  %v502_v54 = vmul.f32 %v1233_v40, %v1871_v46  ;;  %v605_v60 = vmul.f32 %v1747_v17, %v463_v52  ;;  %v606_v23 = vmul.f32 %v1750_v20, %v464_v43 }
 0x1c8   : > { %v552_v63 = vadd.f32 %v549_v42, %v548_v41  ;;  %v607_v11 = vadd.f32 %v604_v6, %v603_v59  ;;  %v658_v14 = vmul.f32 %v1755_v25, %v503_v0  ;;  %v659_v7 = vmul.f32 %v1761_v33, %v504_v57 }
 0x1c9   : > { %v550_v5 = vmul.f32 %v1730_v1, %v501_v53  ;;  %v551_v34 = vmul.f32 %v1733_v4, %v502_v54  ;;  %v505_v46 = vadd.f32 %v501_v53, %v463_v52  ;;  %v506_v31 = vadd.f32 %v502_v54, %v464_v43 }
 0x1ca   : > { %553 = vadd.xlane.f32.xlu0 %v552_v63  ;;  %v610_v16 = vadd.f32 %v606_v23, %v605_v60  ;;  %v662_v8 = vadd.f32 %v659_v7, %v658_v14  ;;  %v715_v17 = vmul.f32 %v1777_v55, %v503_v0  ;;  %v716_v12 = vmul.f32 %v1780_v56, %v504_v57  ;;  %v651_v55 = vpop.xlane.xlu1 %650 }
 0x1cb   : > { %v555_v9 = vadd.f32 %v551_v34, %v550_v5  ;;  %v660_v1 = vmul.f32 %v1764_v35, %v505_v46  ;;  %v661_v4 = vmul.f32 %v1767_v36, %v506_v31  ;;  %v717_v3 = vmul.f32 %v1783_v58, %v505_v46  ;;  %v538_v35 = vpop.xlane.xlu0 %537 }
 0x1cc   : > { %v718_v25 = vmul.f32 %v1786_v10, %v506_v31  ;;  %v719_v33 = vadd.f32 %v716_v12, %v715_v17 }
 0x1cd   : > { %556 = vadd.xlane.f32.xlu1 %v555_v9  ;;  %v665_v20 = vadd.f32 %v661_v4, %v660_v1 }
 0x1ce   : > { %608 = vadd.xlane.f32.xlu0 %v607_v11  ;;  %v722_v13 = vadd.f32 %v718_v25, %v717_v3  ;;  %v708_v58 = vpop.xlane.xlu1 %707  ;;  %v732_v25 = vld [vmem:[#allocation2 + $0x8] sm:$0xff] }
 0x1cf   : > { %v593_v36 = vpop.xlane.xlu0 %592 }
 0x1d1   : > { %611 = vadd.xlane.f32.xlu1 %v610_v16 }
 0x1d2   : > { %663 = vadd.xlane.f32.xlu0 %v662_v8  ;;  %v731_v8 = vld [vmem:[#allocation2] sm:$0xff] }
 0x1d3   : > { %v648_v24 = vpop.xlane.xlu0 %647 }
 0x1d4   : > { %1234 = vlog2.f32 %v648_v24  ;;  %v801_v24 = vld [vmem:[#allocation3] sm:$0x3] (!%p1021_p6) }
 0x1d5   : > { %666 = vadd.xlane.f32.xlu1 %v665_v20  ;;  %1236 = vlog2.f32 %v538_v35  ;;  %802 = vst.msk [vmem:[%s1678_s30] sm:$0x3] (!%p1021_p6), %vm1793_vm2, %v801_v24 }
 0x1d6   : > { %720 = vadd.xlane.f32.xlu0 %v719_v33  ;;  %1238 = vlog2.f32 %v593_v36 }
 0x1d7   : > { %v705_v56 = vpop.xlane.xlu0 %704  ;;  %1240 = vlog2.f32 %v651_v55 }
 0x1d8   : > { %1242 = vlog2.f32 %v705_v56 }
 0x1d9   : > { %723 = vadd.xlane.f32.xlu1 %v722_v13  ;;  %1244 = vlog2.f32 %v596_v18 }
 0x1da   : > { %1246 = vlog2.f32 %v541_v15 }
 0x1db   : > { %1248 = vlog2.f32 %v708_v58 }
 0x1de   : > { %v1235_v10 = vpop.eup %1234 }
 0x1df   : > { %v1237_v44 = vpop.eup %1236  ;;  %v653_v26 = vmul.f32 0.6931472, %v1235_v10 }
 0x1e0   : > { %v1239_v45 = vpop.eup %1238  ;;  %v543_v21 = vmul.f32 0.6931472, %v1237_v44 }
 0x1e1   : > { %v1241_v47 = vpop.eup %1240  ;;  %v598_v51 = vmul.f32 0.6931472, %v1239_v45  ;;  %v656_v41 = vadd.f32 %v653_v26, %v1835_v61 }
 0x1e2   : > { %v1243_v48 = vpop.eup %1242  ;;  %v655_v30 = vmul.f32 0.6931472, %v1241_v47  ;;  %v546_v63 = vadd.f32 %v543_v21, %v1807_v27 }
 0x1e3   : > { %v1245_v50 = vpop.eup %1244  ;;  %v710_v39 = vmul.f32 0.6931472, %v1243_v48  ;;  %v601_v53 = vadd.f32 %v598_v51, %v1819_v37  ;;  %v668_v57 = vmul.f32 2.0, %v656_v41 }
 0x1e4   : > { %v1247_v29 = vpop.eup %1246  ;;  %v600_v42 = vmul.f32 0.6931472, %v1245_v50  ;;  %v657_v43 = vadd.f32 %v655_v30, %v1837_v62 }
 0x1e5   : > { %v1249_v32 = vpop.eup %1248  ;;  %v545_v54 = vmul.f32 0.6931472, %v1247_v29  ;;  %v713_v5 = vadd.f32 %v710_v39, %v1859_v19 }
 0x1e6   : > { %v712_v59 = vmul.f32 0.6931472, %v1249_v32  ;;  %v602_v34 = vadd.f32 %v600_v42, %v1821_v38  ;;  %v669_v37 = vmul.f32 2.0, %v657_v43 }
 0x1e7   : > { %v547_v23 = vadd.f32 %v545_v54, %v1809_v28  ;;  %v725_v14 = vmul.f32 2.0, %v713_v5 }
 0x1e8   : > { %v714_v31 = vadd.f32 %v712_v59, %v1861_v22 }
 0x1ea   : > { %v726_v38 = vmul.f32 2.0, %v714_v31 }
 0x257   : > { %v554_v49 = vpop.xlane.xlu0 %553 }
 0x258   : > { %v558_v9 = vsub.f32 %v546_v63, %v554_v49 }
 0x25a   : > { %v557_v40 = vpop.xlane.xlu1 %556 }
 0x25b   : > { %v609_v52 = vpop.xlane.xlu0 %608  ;;  %v559_v27 = vsub.f32 %v547_v23, %v557_v40 }
 0x25c   : > { %v613_v6 = vsub.f32 %v601_v53, %v609_v52 }
 0x25e   : > { %v612_v0 = vpop.xlane.xlu1 %611  ;;  %v615_v11 = vadd.f32 %v613_v6, %v558_v9 }
 0x25f   : > { %v664_v60 = vpop.xlane.xlu0 %663  ;;  %v614_v46 = vsub.f32 %v602_v34, %v612_v0 }
 0x260   : > { %v670_v61 = vsub.f32 %v668_v57, %v664_v60 }
 0x261   : > { %v616_v19 = vadd.f32 %v614_v46, %v559_v27 }
 0x262   : > { %v667_v62 = vpop.xlane.xlu1 %666  ;;  %v672_v1 = vadd.f32 %v670_v61, %v615_v11 }
 0x263   : > { %v671_v7 = vsub.f32 %v669_v37, %v667_v62  ;;  %v721_v16 = vpop.xlane.xlu0 %720 }
 0x264   : > { %v727_v4 = vsub.f32 %v725_v14, %v721_v16 }
 0x265   : > { %v673_v20 = vadd.f32 %v671_v7, %v616_v19 }
 0x266   : > { %v729_v17 = vadd.f32 %v727_v4, %v672_v1  ;;  %v724_v12 = vpop.xlane.xlu1 %723 }
 0x267   : > { %v728_v28 = vsub.f32 %v726_v38, %v724_v12  ;;  %784 = sbr.rel (%p1021_p6) target bundleno = 838 (0x346), region = 56 }
 0x268   : > { %v733_v3 = vadd.f32 %v731_v8, %v729_v17 }
 0x269   : > { %v730_v33 = vadd.f32 %v728_v28, %v673_v20 }
 0x26a   : > { %736 = vst.msk [vmem:[#allocation2] sm:$0xff] %vm735_vm3, %v733_v3 }
 0x26b   : > { %v734_v22 = vadd.f32 %v732_v25, %v730_v33 }
 0x26d   : > { %737 = vst.msk [vmem:[#allocation2 + $0x8] sm:$0xff] %vm735_vm3, %v734_v22 }
 0x271   : > { %v785_v13 = vld [vmem:[#allocation2] sm:$0xff] }
 0x272   : > { %v787_v15 = vsel %vm735_vm3, %v785_v13, 0.0 }
 0x274   : > { %v786_v35 = vld [vmem:[#allocation2 + $0x8] sm:$0xff] }
 0x275   : > { %v788_v36 = vsel %vm735_vm3, %v786_v35, 0.0 }
 0x276   : > { %v789_v18 = vadd.f32 %v788_v36, %v787_v15 }
 0x278   : > { %790 = vadd.xlane.f32.xlu0 %v789_v18 }
 0x305   : > { %v791_v55 = vpop.xlane.xlu0 %790 }
 0x306   : > { %v792_v56 = vrot.slane %v791_v55, 4 }
 0x308   : > { %v793_v58 = vadd.f32 %v792_v56, %v791_v55 }
 0x30a   : > { %v794_v10 = vrot.slane %v793_v58, 2 }
 0x30c   : > { %v795_v44 = vadd.f32 %v794_v10, %v793_v58 }
 0x30e   : > { %v796_v45 = vrot.slane %v795_v44, 1 }
 0x310   : > { %v797_v47 = vadd.f32 %v796_v45, %v795_v44 }
 0x312   : > { %1033 = vpush %v797_v47 }
 0x343   : > { %s1034_s24 = spop %1033 }
 0x344   : > { %v799_v26 = vstv %s1034_s24 }
 0x345   : > { %800 = vst [vmem:[%s373_s17] sm:$0x1] %v799_v26 }
 0x346 PF: > { %s1023_s6 = sshll.u32 %s1413_s25, 4  ;;  %s821_s8 = sshll.u32 %s373_s17, 4  ;;  %s822_s8 = int_to_ptr.vmem [resolvable:$true] %s821_s8 }
 0x347   : > { %s1921_s9 = scalar_lea.hbm %s2009_s4, %s1023_s6  ;;  %s804_s14 = scalar_lea.sflag [#allocation6], %s1672_s12 }
 0x348   : > { %s1263_s10 = scalar_lea.vmem %s822_s8, 16  ;;  %s1442_s1 = smov [#allocation11]  }
 0x349   : > { %p1264_p7 = scmp.ne.s32.totalorder %s822_s8, %s1263_s10  ;;  %s1267_s11 = sshll.u32 %s1442_s1, 4  ;;  %s1268_s11 = int_to_ptr.vmem [resolvable:$false] %s1267_s11 }
 0x34a   : > { %s1269_s16 = scalar_lea.vmem %s1268_s11, 32  ;;  %p1270_p10 = scmp.lt.s32.totalorder %s822_s8, %s1268_s11 }
 0x34b   : > { %p1265_p4 = pnand %p1264_p7, %p1573_p12  ;;  %p1271_p11 = scmp.lt.s32.totalorder %s1269_s16, %s1263_s10 }
 0x34d   : > { %p1266_p9 = pneg %p1265_p4  ;;  %p1272_p13 = por %p1271_p11, %p1270_p10 }
 0x34f   : > { %p1273_p0 = pnand %p1272_p13, %p1266_p9 }
 0x351   : > { %1276 = shalt.err (!%p1273_p0)
}
 0x352   : > { %s1277_s29 = scalar_lea.hbm %s1921_s9, 16  ;;  %s1281_s27 = scalar_lea.hbm %s2009_s4, 32 }
 0x353   : > { %p1278_p1 = scmp.ne.s32.totalorder %s1921_s9, %s1277_s29  ;;  %p1282_p5 = scmp.lt.u32.totalorder %s1921_s9, %s2009_s4 }
 0x354   : > { %p1283_p6 = scmp.lt.u32.totalorder %s1281_s27, %s1277_s29  ;;  %p1285_p4 = scmp.lt.u32.totalorder %s1277_s29, %s1921_s9 }
 0x355   : > { %p1279_p2 = pnand %p1278_p1, %p1573_p12 }
 0x356   : > { %p1284_p7 = por %p1283_p6, %p1282_p5 }
 0x357   : > { %p1280_p8 = pneg %p1279_p2 }
 0x358   : > { %p1286_p9 = por %p1285_p4, %p1284_p7 }
 0x35a   : > { %p1287_p10 = pnand %p1286_p9, %p1280_p8 }
 0x35c   : > { %1290 = shalt.err (!%p1287_p10)
}
 0x35d   : > { %1057 = dma.vmem_to_hbm [thread:$0]  (%p1573_p12), %s822_s8, 16, %s1921_s9, %s804_s14  }
 0x35e   : > { %s1032_s7 = sshll.u32 %s1413_s25, 5  ;;  %s835_s24 = sshll.u32 %s1678_s30, 4  ;;  %s836_s24 = int_to_ptr.vmem [resolvable:$true] %s835_s24 }
 0x35f   : > { %s2038_s23 = sld [smem:[#allocation34_spill]]  ;;  %s808_s11 = scalar_lea.sflag [#allocation13], %s1672_s12 }
 0x360   : > { %s1291_s16 = scalar_lea.vmem %s836_s24, 32  ;;  %s1443_s29 = smov [#allocation12]  }
 0x361   : > { %p1292_p11 = scmp.ne.s32.totalorder %s836_s24, %s1291_s16  ;;  %s1295_s21 = sshll.u32 %s1443_s29, 4  ;;  %s1296_s21 = int_to_ptr.vmem [resolvable:$false] %s1295_s21 }
 0x362   : > { %s1297_s5 = scalar_lea.vmem %s1296_s21, 64  ;;  %p1298_p1 = scmp.lt.s32.totalorder %s836_s24, %s1296_s21 }
 0x363   : > { %p1293_p13 = pnand %p1292_p11, %p1573_p12  ;;  %p1299_p2 = scmp.lt.s32.totalorder %s1297_s5, %s1291_s16 }
 0x365   : > { %s2039_s10 = smov %s2038_s23  ;;  %s1948_s1 = scalar_lea.hbm %s2038_s23, %s1032_s7 }
 0x366   : > { %p1294_p0 = pneg %p1293_p13  ;;  %p1300_p8 = por %p1299_p2, %p1298_p1 }
 0x368   : > { %p1301_p5 = pnand %p1300_p8, %p1294_p0 }
 0x36a   : > { %1304 = shalt.err (!%p1301_p5)
}
 0x36b   : > { %s1305_s25 = scalar_lea.hbm %s1948_s1, 32  ;;  %s1309_s9 = scalar_lea.hbm %s2039_s10, 64 }
 0x36c   : > { %p1306_p6 = scmp.ne.s32.totalorder %s1948_s1, %s1305_s25  ;;  %p1310_p9 = scmp.lt.u32.totalorder %s1948_s1, %s2039_s10 }
 0x36d   : > { %p1311_p10 = scmp.lt.u32.totalorder %s1309_s9, %s1305_s25  ;;  %p1313_p13 = scmp.lt.u32.totalorder %s1305_s25, %s1948_s1 }
 0x36e   : > { %p1307_p7 = pnand %p1306_p6, %p1573_p12 }
 0x36f   : > { %p1312_p11 = por %p1311_p10, %p1310_p9 }
 0x370   : > { %p1308_p4 = pneg %p1307_p7 }
 0x371   : > { %p1314_p0 = por %p1313_p13, %p1312_p11 }
 0x373   : > { %p1315_p1 = pnand %p1314_p0, %p1308_p4 }
 0x375   : > { %1318 = shalt.err (!%p1315_p1)
}
 0x376   : > { %1058 = dma.vmem_to_hbm [thread:$0]  (%p1573_p12), %s836_s24, 32, %s1948_s1, %s808_s11  }
 0x377 PF: > { %p1074_p2 = scmp.ge.s32.totalorder %s1425_s28, 2  ;;  %s847_s27 = sand.u32 1, %s1385_s18  }
 0x378   : > { %s848_s17 = scalar_lea.sflag [#allocation6], %s847_s27 }
 0x379   : > { %p1066_p8 = pnand %p1074_p2, %p1583_p3 }
 0x37b   : > { %1376 = dma.done.wait (!%p1066_p8), %s848_s17, 16  }
 0x37c   : > { %1378 = vsyncadd (!%p1066_p8), %s848_s17, 4294967280  ;;  %s856_s13 = scalar_lea.sflag [#allocation13], %s847_s27 }
 0x37d   : > { %1380 = dma.done.wait (!%p1066_p8), %s856_s13, 32  }
 0x37e   : > { %1382 = vsyncadd (!%p1066_p8), %s856_s13, 4294967264  ;;  %s29_s28 = sadd.s32 1, %s1425_s28   ;;  %s2040_s26 = sld [smem:[#allocation30_spill]] }
 0x37f   : > { %p26_p5 = scmp.ge.s32.totalorder %s29_s28, 6   ;;  %s2041_s7 = sld [smem:[#allocation25_spill]] }
 0x380   : > { %s2042_s23 = sld [smem:[#allocation31_spill]]  ;;  %s2043_s24 = sld [smem:[#allocation26_spill]] }
 0x381   : > { %s2044_s25 = sld [smem:[#allocation27_spill]]  ;;  %s2045_s6 = sld [smem:[#allocation28_spill]] }
 0x382   : > { %s2046_s27 = sld [smem:[#allocation29_spill]]  ;;  %s2047_s18 = smov %s1389_s19 }
 0x383   : > { %s2048_s19 = smov %s1393_s20  ;;  %s2050_s21 = smov %s1401_s22 }
 0x384   : > { %s2049_s20 = smov %s2040_s26  ;;  %28 = sbr.rel (!%p26_p5) target bundleno = 18 (0x12), region = 138 }
 0x385   : > { %s2051_s22 = smov %s2041_s7 }
 0x387   : > { %s2052_s26 = smov %s2045_s6 }
 0x38b   :  { %861 = vsyncpa [#allocation5], 1 }
 0x38c   :  { %863 = vsyncpa [#allocation5 + $0x1], 1 }
 0x38d   :  { %864 = vsyncpa [#allocation10], 1 }
 0x38e   :  { %866 = vsyncpa [#allocation10 + $0x1], 1 }
 0x38f   :  { %867 = vsyncpa [#allocation6], 1 }
 0x390   :  { %869 = vsyncpa [#allocation6 + $0x1], 1 }
 0x391   :  { %870 = vsyncpa [#allocation13], 1 }
 0x392   :  { %872 = vsyncpa [#allocation13 + $0x1], 1 }
 0x393   :  { %873 = vsyncpa [#allocation7], 1 }
 0x394   :  { %875 = vsyncpa [#allocation7 + $0x1], 1 }

</bundles_post_ra>
